<compile_context>
chip_gen: v7x
topology: tpu7x:2x2x1
jax: 0.10.0
libtpu: 0.0.40
codegen_flags: <defaults>
</compile_context>

<pallas_src>
import functools

import jax
import jax.numpy as jnp
from jax.experimental import pallas as pl
from jax.experimental.pallas import tpu as pltpu

_LANES = 128
_GROUPS_PER_BLOCK = 1024           # ~4 MiB per native-dtype input block
_CHUNK_ELEMS = 8 * 8 * _LANES      # 8192 elems per inner chunk (~8 f32 vregs/temp)


def _sublanes_for(*dtypes):
    """Native sublane packing: 8 for 32-bit, 16 for 16-bit, 32 for 8-bit."""
    s = 8
    for dt in dtypes:
        itemsize = jnp.dtype(dt).itemsize
        s = max(s, min(32, 32 // max(1, itemsize)))
    return s


def _tensorcore_splits():
    """How many TensorCores a 'parallel' grid axis can be sharded across."""
    try:
        kind = jax.devices()[0].device_kind.lower()
    except Exception:
        return 1
    # v7x exposes 2 TensorCores per device; v5e/v6e have a single one.
    return 2 if ("v7" in kind or "tpu7" in kind) else 1


def _masked_mse_kernel(yp_ref, yt_ref, out_ref, *,
                       n_groups, g_block, chunk, steps, sublanes):
    c = pl.program_id(0)            # core-split index ("parallel")
    i = pl.program_id(1)            # reduction step   ("arbitrary")

    @pl.when(i == 0)
    def _init():
        out_ref[...] = jnp.zeros_like(out_ref)

    # Scalar bookkeeping only -- no per-element index tensors on the hot path.
    g0 = (c * steps + i) * g_block          # first logical group of this step
    rem = n_groups - g0                     # valid groups in this block (may be <= 0)

    n_chunks = g_block // chunk             # static; chunk always divides g_block

    def _accumulate(masked):
        def body(t, carry):
            num, den = carry
            start = pl.multiple_of(t * chunk, chunk)
            yp = yp_ref[pl.ds(start, chunk)].astype(jnp.float32)
            yt = yt_ref[pl.ds(start, chunk)].astype(jnp.float32)
            sel = yt > 0.0
            if masked:
                # Only the (at most one) partial block per split pays for this.
                gid = start + jax.lax.broadcasted_iota(
                    jnp.int32, (chunk, sublanes, _LANES), 0)
                sel = jnp.logical_and(sel, gid < rem)
            diff = yp - yt
            # select semantics: unspecified padding / NaN never leaks in.
            num = num + jnp.sum(jnp.where(sel, diff * diff, 0.0), axis=0)
            den = den + jnp.sum(sel.astype(jnp.float32), axis=0)
            return num, den

        zero = jnp.zeros((sublanes, _LANES), jnp.float32)
        num, den = jax.lax.fori_loop(0, n_chunks, body, (zero, zero))
        out_ref[0] += num
        out_ref[1] += den

    @pl.when(rem >= g_block)                                # fast path: full block
    def _full():
        _accumulate(masked=False)

    @pl.when(jnp.logical_and(rem > 0, rem < g_block))       # partial last block
    def _partial():
        _accumulate(masked=True)
    # rem <= 0: clamped duplicate block of this split -> skip compute entirely.


def masked_mse_loss(y_pred, y_true):
    assert y_pred.shape == y_true.shape
    yp = jnp.ravel(y_pred)                  # native dtype; cast happens in-kernel
    yt = jnp.ravel(y_true)
    n = yp.shape[0]

    sublanes = _sublanes_for(yp.dtype, yt.dtype)
    group = sublanes * _LANES
    chunk_pref = max(1, _CHUNK_ELEMS // group)

    n_groups = n // group
    r = n - n_groups * group                # ragged sub-group tail (< group elems)

    num = jnp.float32(0.0)
    den = jnp.float32(0.0)

    if n_groups > 0:
        chunk = min(chunk_pref, n_groups)
        g_block = min(_GROUPS_PER_BLOCK, (n_groups // chunk) * chunk)
        num_blocks = pl.cdiv(n_groups, g_block)

        splits = _tensorcore_splits()
        if num_blocks < 4:                  # split is pure overhead for tiny grids
            splits = 1
        steps = pl.cdiv(num_blocks, splits)

        n_main = n_groups * group
        # Exact multiples of one (sublanes, 128) group reshape for free; only a
        # ragged tail forces a prefix slice of the main part.
        yp3 = (yp if r == 0 else yp[:n_main]).reshape(n_groups, sublanes, _LANES)
        yt3 = (yt if r == 0 else yt[:n_main]).reshape(n_groups, sublanes, _LANES)

        def in_map(c, i):
            # Clamp the (at most one) overhanging step of the second split onto
            # its own last block: the same-index revisit skips the input DMA and
            # the kernel skips compute via `rem <= 0`.
            return (jnp.minimum(c * steps + i, num_blocks - 1), 0, 0)

        kernel = functools.partial(
            _masked_mse_kernel, n_groups=n_groups, g_block=g_block,
            chunk=chunk, steps=steps, sublanes=sublanes)

        out = pl.pallas_call(
            kernel,
            out_shape=jax.ShapeDtypeStruct(
                (splits, 2, sublanes, _LANES), jnp.float32),
            grid_spec=pltpu.PrefetchScalarGridSpec(
                num_scalar_prefetch=0,
                grid=(splits, steps),
                in_specs=[
                    pl.BlockSpec((g_block, sublanes, _LANES), in_map),
                    pl.BlockSpec((g_block, sublanes, _LANES), in_map),
                ],
                out_specs=pl.BlockSpec((None, 2, sublanes, _LANES),
                                       lambda c, i: (c, 0, 0, 0)),
            ),
            compiler_params=pltpu.CompilerParams(
                dimension_semantics=("parallel", "arbitrary"),
                vmem_limit_bytes=32 * 1024 * 1024,
            ),
        )(yp3, yt3)

        num = num + jnp.sum(out[:, 0])
        den = den + jnp.sum(out[:, 1])

    if r > 0:
        # Tiny ragged tail (< sublanes*128 elements): a few plain-JAX ops.
        tp = yp[n_groups * group:].astype(jnp.float32)
        tt = yt[n_groups * group:].astype(jnp.float32)
        tm = (tt > 0).astype(jnp.float32)
        num = num + jnp.sum((tp - tt) ** 2 * tm)
        den = den + jnp.sum(tm)

    # mask.sum() == 0 -> NaN/Inf, same as the PyTorch reference.
    return num / den


if __name__ == "__main__":
    key = jax.random.PRNGKey(0)
    k1, k2, k3, k4 = jax.random.split(key, 4)

    def _reference(y_pred, y_true):
        ypf = y_pred.astype(jnp.float32)
        ytf = y_true.astype(jnp.float32)
        mask = (ytf > 0).astype(jnp.float32)
        return jnp.sum((ypf - ytf) ** 2 * mask) / jnp.sum(mask)

    # Small NCHW-style tensors (exact multiple of one (8,128) group).
    x_shape = (2, 4, 16, 16)
    y_pred = jax.random.normal(k1, x_shape, dtype=jnp.float32)
    y_true = jax.random.normal(k2, x_shape, dtype=jnp.float32)   # mixed sign -> mask
    loss = jax.block_until_ready(masked_mse_loss(y_pred, y_true))
    ref = _reference(y_pred, y_true)
    assert jnp.allclose(loss, ref, rtol=1e-5, atol=1e-5), (loss, ref)

    # Ragged size: exercises the partial-block slow path and the JAX tail.
    y_pred2 = jax.random.normal(k3, (5, 2021), dtype=jnp.float32)
    y_true2 = jax.random.normal(k4, (5, 2021), dtype=jnp.float32)
    loss2 = jax.block_until_ready(masked_mse_loss(y_pred2, y_true2))
    ref2 = _reference(y_pred2, y_true2)
    assert jnp.allclose(loss2, ref2, rtol=1e-5, atol=1e-5), (loss2, ref2)

    print("KERNEL_OK")
</pallas_src>

<mosaic_0001>
module attributes {stable_mosaic.version = 11 : i64} {
  func.func @_masked_mse_kernel(%arg0: i32, %arg1: i32, %arg2: memref<2x8x128xf32, #tpu.memory_space<vmem>>, %arg3: memref<2x8x128xf32, #tpu.memory_space<vmem>>, %arg4: memref<1x2x8x128xf32, #tpu.memory_space<vmem>>) attributes {dimension_semantics = [#tpu.dimension_semantics<parallel>, #tpu.dimension_semantics<arbitrary>], iteration_bounds = array<i64: 1, 1>, scalar_prefetch = 0 : i64, scratch_operands = 0 : i64, tpu.core_type = #tpu.core_type<tc>, window_params = [{transform_indices = @transform_0, window_bounds = array<i64: 2, 8, 128>}, {transform_indices = @transform_1, window_bounds = array<i64: 2, 8, 128>}, {transform_indices = @transform_2, window_bounds = array<i64: 1, 2, 8, 128>}]} {
    %c0_i32 = arith.constant 0 : i32
    %0 = arith.cmpi eq, %arg1, %c0_i32 : i32
    %1 = arith.extui %0 : i1 to i32
    %c0_i32_0 = arith.constant 0 : i32
    %2 = arith.cmpi ne, %1, %c0_i32_0 : i32
    scf.if %2 {
      %cst = arith.constant 0.000000e+00 : f32
      %15 = vector.broadcast %cst : f32 to vector<2x8x128xf32>
      %c0 = arith.constant 0 : index
      %c0_7 = arith.constant 0 : index
      %c0_8 = arith.constant 0 : index
      %c0_9 = arith.constant 0 : index
      %16 = vector.load %arg4[%c0, %c0_7, %c0_8, %c0_9] : memref<1x2x8x128xf32, #tpu.memory_space<vmem>>, vector<1x2x8x128xf32>
      %17 = vector.shape_cast %16 : vector<1x2x8x128xf32> to vector<2x8x128xf32>
      %18 = vector.shape_cast %15 : vector<2x8x128xf32> to vector<1x2x8x128xf32>
      tpu.vector_store %arg4[%c0, %c0_7, %c0_8, %c0_9], %18 {strides = array<i32>} : memref<1x2x8x128xf32, #tpu.memory_space<vmem>>, vector<1x2x8x128xf32>,
    } else {
    }
    %c1_i32 = arith.constant 1 : i32
    %3 = arith.muli %arg0, %c1_i32 : i32
    %4 = arith.addi %3, %arg1 : i32
    %c2_i32 = arith.constant 2 : i32
    %5 = arith.muli %4, %c2_i32 : i32
    %c2_i32_1 = arith.constant 2 : i32
    %6 = arith.subi %c2_i32_1, %5 : i32
    %c2_i32_2 = arith.constant 2 : i32
    %7 = arith.cmpi sge, %6, %c2_i32_2 : i32
    %8 = arith.extui %7 : i1 to i32
    %c0_i32_3 = arith.constant 0 : i32
    %9 = arith.cmpi ne, %8, %c0_i32_3 : i32
    scf.if %9 {
      %cst = arith.constant 0.000000e+00 : f32
      %15 = vector.broadcast %cst : f32 to vector<8x128xf32>
      %c0_i32_7 = arith.constant 0 : i32
      %c2_i32_8 = arith.constant 2 : i32
      %16 = arith.muli %c0_i32_7, %c2_i32_8 : i32
      %17 = tpu.assume_multiple %16, 2 : i32
      %18 = arith.index_cast %17 : i32 to index
      %c0 = arith.constant 0 : index
      %c0_9 = arith.constant 0 : index
      %19 = vector.load %arg2[%18, %c0, %c0_9] : memref<2x8x128xf32, #tpu.memory_space<vmem>>, vector<2x8x128xf32>
      %20 = arith.index_cast %17 : i32 to index
      %c0_10 = arith.constant 0 : index
      %c0_11 = arith.constant 0 : index
      %21 = vector.load %arg3[%20, %c0_10, %c0_11] : memref<2x8x128xf32, #tpu.memory_space<vmem>>, vector<2x8x128xf32>
      %cst_12 = arith.constant 0.000000e+00 : f32
      %22 = vector.broadcast %cst_12 : f32 to vector<2x8x128xf32>
      %23 = arith.cmpf ogt, %21, %22 : vector<2x8x128xf32>
      %24 = arith.subf %19, %21 : vector<2x8x128xf32>
      %25 = arith.mulf %24, %24 : vector<2x8x128xf32>
      %cst_13 = arith.constant 0.000000e+00 : f32
      %26 = vector.broadcast %cst_13 : f32 to vector<2x8x128xf32>
      %27 = arith.select %23, %25, %26 : vector<2x8x128xi1>, vector<2x8x128xf32>
      %cst_14 = arith.constant dense<0.000000e+00> : vector<8x128xf32>
      %28 = vector.multi_reduction <add>, %27, %cst_14 [0] : vector<2x8x128xf32> to vector<8x128xf32>
      %29 = arith.addf %15, %28 : vector<8x128xf32>
      %30 = arith.extui %23 : vector<2x8x128xi1> to vector<2x8x128xi32>
      %31 = arith.sitofp %30 : vector<2x8x128xi32> to vector<2x8x128xf32>
      %cst_15 = arith.constant dense<0.000000e+00> : vector<8x128xf32>
      %32 = vector.multi_reduction <add>, %31, %cst_15 [0] : vector<2x8x128xf32> to vector<8x128xf32>
      %33 = arith.addf %15, %32 : vector<8x128xf32>
      %c1_i32_16 = arith.constant 1 : i32
      %c0_17 = arith.constant 0 : index
      %c0_18 = arith.constant 0 : index
      %c0_19 = arith.constant 0 : index
      %c0_20 = arith.constant 0 : index
      %34 = vector.load %arg4[%c0_17, %c0_18, %c0_19, %c0_20] : memref<1x2x8x128xf32, #tpu.memory_space<vmem>>, vector<1x1x8x128xf32>
      %35 = vector.shape_cast %34 : vector<1x1x8x128xf32> to vector<8x128xf32>
      %36 = arith.addf %35, %29 : vector<8x128xf32>
      %c0_21 = arith.constant 0 : index
      %c0_22 = arith.constant 0 : index
      %c0_23 = arith.constant 0 : index
      %c0_24 = arith.constant 0 : index
      %37 = vector.load %arg4[%c0_21, %c0_22, %c0_23, %c0_24] : memref<1x2x8x128xf32, #tpu.memory_space<vmem>>, vector<1x1x8x128xf32>
      %38 = vector.shape_cast %37 : vector<1x1x8x128xf32> to vector<8x128xf32>
      %39 = vector.shape_cast %36 : vector<8x128xf32> to vector<1x1x8x128xf32>
      tpu.vector_store %arg4[%c0_21, %c0_22, %c0_23, %c0_24], %39 {strides = array<i32>} : memref<1x2x8x128xf32, #tpu.memory_space<vmem>>, vector<1x1x8x128xf32>,
      %c0_25 = arith.constant 0 : index
      %c1 = arith.constant 1 : index
      %c0_26 = arith.constant 0 : index
      %c0_27 = arith.constant 0 : index
      %40 = vector.load %arg4[%c0_25, %c1, %c0_26, %c0_27] : memref<1x2x8x128xf32, #tpu.memory_space<vmem>>, vector<1x1x8x128xf32>
      %41 = vector.shape_cast %40 : vector<1x1x8x128xf32> to vector<8x128xf32>
      %42 = arith.addf %41, %33 : vector<8x128xf32>
      %c0_28 = arith.constant 0 : index
      %c1_29 = arith.constant 1 : index
      %c0_30 = arith.constant 0 : index
      %c0_31 = arith.constant 0 : index
      %43 = vector.load %arg4[%c0_28, %c1_29, %c0_30, %c0_31] : memref<1x2x8x128xf32, #tpu.memory_space<vmem>>, vector<1x1x8x128xf32>
      %44 = vector.shape_cast %43 : vector<1x1x8x128xf32> to vector<8x128xf32>
      %45 = vector.shape_cast %42 : vector<8x128xf32> to vector<1x1x8x128xf32>
      tpu.vector_store %arg4[%c0_28, %c1_29, %c0_30, %c0_31], %45 {strides = array<i32>} : memref<1x2x8x128xf32, #tpu.memory_space<vmem>>, vector<1x1x8x128xf32>,
    } else {
    }
    %c0_i32_4 = arith.constant 0 : i32
    %10 = arith.cmpi sgt, %6, %c0_i32_4 : i32
    %c2_i32_5 = arith.constant 2 : i32
    %11 = arith.cmpi slt, %6, %c2_i32_5 : i32
    %12 = arith.andi %10, %11 : i1
    %13 = arith.extui %12 : i1 to i32
    %c0_i32_6 = arith.constant 0 : i32
    %14 = arith.cmpi ne, %13, %c0_i32_6 : i32
    scf.if %14 {
      %cst = arith.constant 0.000000e+00 : f32
      %15 = vector.broadcast %cst : f32 to vector<8x128xf32>
      %c0_i32_7 = arith.constant 0 : i32
      %c2_i32_8 = arith.constant 2 : i32
      %16 = arith.muli %c0_i32_7, %c2_i32_8 : i32
      %17 = tpu.assume_multiple %16, 2 : i32
      %18 = arith.index_cast %17 : i32 to index
      %c0 = arith.constant 0 : index
      %c0_9 = arith.constant 0 : index
      %19 = vector.load %arg2[%18, %c0, %c0_9] : memref<2x8x128xf32, #tpu.memory_space<vmem>>, vector<2x8x128xf32>
      %20 = arith.index_cast %17 : i32 to index
      %c0_10 = arith.constant 0 : index
      %c0_11 = arith.constant 0 : index
      %21 = vector.load %arg3[%20, %c0_10, %c0_11] : memref<2x8x128xf32, #tpu.memory_space<vmem>>, vector<2x8x128xf32>
      %cst_12 = arith.constant 0.000000e+00 : f32
      %22 = vector.broadcast %cst_12 : f32 to vector<2x8x128xf32>
      %23 = arith.cmpf ogt, %21, %22 : vector<2x8x128xf32>
      %24 = tpu.iota {dimensions = array<i32: 0>} : vector<2x8x128xi32>
      %25 = vector.broadcast %17 : i32 to vector<2x8x128xi32>
      %26 = arith.addi %25, %24 : vector<2x8x128xi32>
      %27 = vector.broadcast %6 : i32 to vector<2x8x128xi32>
      %28 = arith.cmpi slt, %26, %27 : vector<2x8x128xi32>
      %29 = arith.andi %23, %28 : vector<2x8x128xi1>
      %30 = arith.subf %19, %21 : vector<2x8x128xf32>
      %31 = arith.mulf %30, %30 : vector<2x8x128xf32>
      %cst_13 = arith.constant 0.000000e+00 : f32
      %32 = vector.broadcast %cst_13 : f32 to vector<2x8x128xf32>
      %33 = arith.select %29, %31, %32 : vector<2x8x128xi1>, vector<2x8x128xf32>
      %cst_14 = arith.constant dense<0.000000e+00> : vector<8x128xf32>
      %34 = vector.multi_reduction <add>, %33, %cst_14 [0] : vector<2x8x128xf32> to vector<8x128xf32>
      %35 = arith.addf %15, %34 : vector<8x128xf32>
      %36 = arith.extui %29 : vector<2x8x128xi1> to vector<2x8x128xi32>
      %37 = arith.sitofp %36 : vector<2x8x128xi32> to vector<2x8x128xf32>
      %cst_15 = arith.constant dense<0.000000e+00> : vector<8x128xf32>
      %38 = vector.multi_reduction <add>, %37, %cst_15 [0] : vector<2x8x128xf32> to vector<8x128xf32>
      %39 = arith.addf %15, %38 : vector<8x128xf32>
      %c1_i32_16 = arith.constant 1 : i32
      %c0_17 = arith.constant 0 : index
      %c0_18 = arith.constant 0 : index
      %c0_19 = arith.constant 0 : index
      %c0_20 = arith.constant 0 : index
      %40 = vector.load %arg4[%c0_17, %c0_18, %c0_19, %c0_20] : memref<1x2x8x128xf32, #tpu.memory_space<vmem>>, vector<1x1x8x128xf32>
      %41 = vector.shape_cast %40 : vector<1x1x8x128xf32> to vector<8x128xf32>
      %42 = arith.addf %41, %35 : vector<8x128xf32>
      %c0_21 = arith.constant 0 : index
      %c0_22 = arith.constant 0 : index
      %c0_23 = arith.constant 0 : index
      %c0_24 = arith.constant 0 : index
      %43 = vector.load %arg4[%c0_21, %c0_22, %c0_23, %c0_24] : memref<1x2x8x128xf32, #tpu.memory_space<vmem>>, vector<1x1x8x128xf32>
      %44 = vector.shape_cast %43 : vector<1x1x8x128xf32> to vector<8x128xf32>
      %45 = vector.shape_cast %42 : vector<8x128xf32> to vector<1x1x8x128xf32>
      tpu.vector_store %arg4[%c0_21, %c0_22, %c0_23, %c0_24], %45 {strides = array<i32>} : memref<1x2x8x128xf32, #tpu.memory_space<vmem>>, vector<1x1x8x128xf32>,
      %c0_25 = arith.constant 0 : index
      %c1 = arith.constant 1 : index
      %c0_26 = arith.constant 0 : index
      %c0_27 = arith.constant 0 : index
      %46 = vector.load %arg4[%c0_25, %c1, %c0_26, %c0_27] : memref<1x2x8x128xf32, #tpu.memory_space<vmem>>, vector<1x1x8x128xf32>
      %47 = vector.shape_cast %46 : vector<1x1x8x128xf32> to vector<8x128xf32>
      %48 = arith.addf %47, %39 : vector<8x128xf32>
      %c0_28 = arith.constant 0 : index
      %c1_29 = arith.constant 1 : index
      %c0_30 = arith.constant 0 : index
      %c0_31 = arith.constant 0 : index
      %49 = vector.load %arg4[%c0_28, %c1_29, %c0_30, %c0_31] : memref<1x2x8x128xf32, #tpu.memory_space<vmem>>, vector<1x1x8x128xf32>
      %50 = vector.shape_cast %49 : vector<1x1x8x128xf32> to vector<8x128xf32>
      %51 = vector.shape_cast %48 : vector<8x128xf32> to vector<1x1x8x128xf32>
      tpu.vector_store %arg4[%c0_28, %c1_29, %c0_30, %c0_31], %51 {strides = array<i32>} : memref<1x2x8x128xf32, #tpu.memory_space<vmem>>, vector<1x1x8x128xf32>,
    } else {
    }
    return
  }
  func.func @transform_0(%arg0: i32, %arg1: i32) -> (i32, i32, i32) {
    %c1_i32 = arith.constant 1 : i32
    %0 = arith.muli %arg0, %c1_i32 : i32
    %1 = arith.addi %0, %arg1 : i32
    %c0_i32 = arith.constant 0 : i32
    %2 = arith.minsi %1, %c0_i32 : i32
    %c0_i32_0 = arith.constant 0 : i32
    %c0_i32_1 = arith.constant 0 : i32
    %c0_i32_2 = arith.constant 0 : i32
    return %2, %c0_i32_0, %c0_i32_1 : i32, i32, i32
  }
  func.func @transform_1(%arg0: i32, %arg1: i32) -> (i32, i32, i32) {
    %c1_i32 = arith.constant 1 : i32
    %0 = arith.muli %arg0, %c1_i32 : i32
    %1 = arith.addi %0, %arg1 : i32
    %c0_i32 = arith.constant 0 : i32
    %2 = arith.minsi %1, %c0_i32 : i32
    %c0_i32_0 = arith.constant 0 : i32
    %c0_i32_1 = arith.constant 0 : i32
    %c0_i32_2 = arith.constant 0 : i32
    return %2, %c0_i32_0, %c0_i32_1 : i32, i32, i32
  }
  func.func @transform_2(%arg0: i32, %arg1: i32) -> (i32, i32, i32, i32) {
    %c0_i32 = arith.constant 0 : i32
    %c0_i32_0 = arith.constant 0 : i32
    %c0_i32_1 = arith.constant 0 : i32
    %c0_i32_2 = arith.constant 0 : i32
    return %arg0, %c0_i32, %c0_i32_0, %c0_i32_1 : i32, i32, i32, i32
  }
}

</mosaic_0001>

<bundles_post_ra>
// kernel: tpu_custom_call.1
= control target key start
LH: loop header
LB: loop body
LE: loop exit
PB: predicated region body
PF: predicated region fallthrough
CT: control target
= control target key end

     0   :  { %7 = vsyncpa [#allocation3], 0  ;;  %s316_s0 = inlined_call_operand.hbm [shape: f32[2,8,128], index: 0, kind: input, shape index: {}]   ;;  %s317_s1 = inlined_call_operand.hbm [shape: f32[2,8,128], index: 1, kind: input, shape index: {}]   ;;  %s318_s2 = inlined_call_operand.hbm [shape: f32[1,2,8,128], index: 2, kind: output, shape index: {}]  }
   0x1   :  { %8 = vsyncpa [#allocation6], 0 }
   0x2   :  { %9 = vsyncpa [#allocation4], 0  ;;  %s250_s9 = smov [#allocation2]   ;;  %s178_s13 = scalar_lea.hbm %s316_s0, 256 }
   0x3   :  { %s21_s10 = sshll.u32 %s250_s9, 4  ;;  %p179_p0 = scmp.ne.s32.totalorder %s316_s0, %s178_s13  ;;  %s22_s10 = int_to_ptr.vmem [resolvable:$true] %s21_s10 }
   0x4   :  { %p182_p1 = scmp.lt.u32.totalorder %s178_s13, %s316_s0 }
   0x6   :  { %p184_p2 = pnand %p182_p1, %p179_p0 }
   0x8   :  { %187 = shalt.err (!%p184_p2)
}
   0x9   :  { %s188_s18 = scalar_lea.vmem %s22_s10, 256  ;;  %p193_p4 = scmp.lt.s32.totalorder %s22_s10, %s22_s10 }
   0xa   :  { %p189_p3 = scmp.ne.s32.totalorder %s22_s10, %s188_s18  ;;  %p194_p5 = scmp.lt.s32.totalorder %s188_s18, %s188_s18 }
   0xc   :  { %p195_p6 = por %p194_p5, %p193_p4 }
   0xe   :  { %p196_p7 = pnand %p195_p6, %p189_p3 }
  0x10   :  { %199 = shalt.err (!%p196_p7)
}
  0x11   :  { %s251_s19 = smov 128   ;;  %s252_s20 = smov 8  }
  0x12   :  { %27 = dma.hbm_to_vmem [thread:$0]  %s316_s0, 256, %s22_s10, [#allocation3], %s251_s19, %s251_s19, %s252_s20  }
  0x13   :  { %s253_s23 = smov [#allocation5]   ;;  %s200_s27 = scalar_lea.hbm %s317_s1, 256 }
  0x14   :  { %s39_s24 = sshll.u32 %s253_s23, 4  ;;  %p201_p8 = scmp.ne.s32.totalorder %s317_s1, %s200_s27  ;;  %s40_s24 = int_to_ptr.vmem [resolvable:$true] %s39_s24 }
  0x15   :  { %p204_p9 = scmp.lt.u32.totalorder %s200_s27, %s317_s1 }
  0x17   :  { %p206_p10 = pnand %p204_p9, %p201_p8 }
  0x19   :  { %209 = shalt.err (!%p206_p10)
}
  0x1a   :  { %s210_s4 = scalar_lea.vmem %s40_s24, 256  ;;  %p215_p12 = scmp.lt.s32.totalorder %s40_s24, %s40_s24 }
  0x1b   :  { %p211_p11 = scmp.ne.s32.totalorder %s40_s24, %s210_s4  ;;  %p216_p13 = scmp.lt.s32.totalorder %s210_s4, %s210_s4 }
  0x1d   :  { %p217_p0 = por %p216_p13, %p215_p12 }
  0x1f   :  { %p218_p1 = pnand %p217_p0, %p211_p11 }
  0x21   :  { %221 = shalt.err (!%p218_p1)
}
  0x22   :  { %45 = dma.hbm_to_vmem [thread:$0]  %s317_s1, 256, %s40_s24, [#allocation6], %s251_s19, %s251_s19, %s252_s20  }
  0x23   :  { %244 = dma.done.wait [#allocation3], 256  }
  0x24   :  { %245 = vsyncadd [#allocation3], 4294967040 }
  0x25   :  { %246 = dma.done.wait [#allocation6], 256  }
  0x26   :  { %247 = vsyncadd [#allocation6], 4294967040  ;;  %v75_v0 = vld [vmem:[#allocation2] sm:$0xff]  ;;  %v76_v1 = vld [vmem:[#allocation2 + $0x8] sm:$0xff]  ;;  %v254_v6 = vmov 0.0   ;;  %s255_s1 = smov [#allocation7]  }
  0x27   :  { %v78_v2 = vld [vmem:[#allocation5] sm:$0xff]  ;;  %v79_v3 = vld [vmem:[#allocation5 + $0x8] sm:$0xff]  ;;  %s151_s6 = sshll.u32 %s255_s1, 4  ;;  %s152_s6 = int_to_ptr.vmem [resolvable:$true] %s151_s6 }
  0x28   :  { %vm80_vm0 = vcmp.gt.f32.partialorder %v78_v2, 0.0  ;;  %v82_v4 = vsub.f32 %v75_v0, %v78_v2  ;;  %vm81_vm1 = vcmp.gt.f32.partialorder %v79_v3, 0.0  ;;  %v83_v5 = vsub.f32 %v76_v1, %v79_v3  ;;  %s222_s7 = scalar_lea.vmem %s152_s6, 256  ;;  %p227_p3 = scmp.lt.s32.totalorder %s152_s6, %s152_s6 }
  0x29   :  { %v168_v7 = vsel %vm80_vm0, 1.0, %v254_v6  ;;  %v169_v9 = vsel %vm81_vm1, 1.0, %v254_v6  ;;  %p223_p2 = scmp.ne.s32.totalorder %s152_s6, %s222_s7  ;;  %p228_p4 = scmp.lt.s32.totalorder %s222_s7, %s222_s7 }
  0x2a   :  { %v84_v8 = vmul.f32 %v82_v4, %v82_v4  ;;  %v85_v10 = vmul.f32 %v83_v5, %v83_v5  ;;  %v94_v11 = vadd.f32 %v169_v9, %v168_v7 }
  0x2b   :  { %p229_p5 = por %p228_p4, %p227_p3 }
  0x2c   :  { %v86_v12 = vsel %vm80_vm0, %v84_v8, 0.0  ;;  %v87_v13 = vsel %vm81_vm1, %v85_v10, 0.0  ;;  %102 = vst [vmem:[#allocation7 + $0x8] sm:$0xff] %v94_v11 }
  0x2d   :  { %v88_v14 = vadd.f32 %v87_v13, %v86_v12  ;;  %p230_p6 = pnand %p229_p5, %p223_p2 }
  0x2f   :  { %98 = vst [vmem:[#allocation7] sm:$0xff] %v88_v14 }
  0x30   :  { %233 = shalt.err (!%p230_p6)
}
  0x31   :  { %s234_s10 = scalar_lea.hbm %s318_s2, 256 }
  0x32   :  { %p235_p7 = scmp.ne.s32.totalorder %s318_s2, %s234_s10  ;;  %p238_p8 = scmp.lt.u32.totalorder %s234_s10, %s318_s2 }
  0x34   :  { %p240_p9 = pnand %p238_p8, %p235_p7 }
  0x36   :  { %243 = shalt.err (!%p240_p9)
}
  0x37   :  { %157 = dma.vmem_to_hbm [thread:$0]  %s152_s6, 256, %s318_s2, [#allocation4], %s251_s19, %s251_s19, %s252_s20  }
  0x38   :  { %248 = dma.done.wait [#allocation4], 256  }
  0x39   :  { %249 = vsyncadd [#allocation4], 4294967040 }
  0x3a   :  { %161 = vsyncpa [#allocation3], 1 }
  0x3b   :  { %162 = vsyncpa [#allocation6], 1 }
  0x3c   :  { %163 = vsyncpa [#allocation4], 1 }

</bundles_post_ra>
